<compile_context>
chip_gen: v7x
topology: tpu7x:2x2x1
jax: 0.10.0
libtpu: 0.0.40
codegen_flags: <defaults>
</compile_context>

<pallas_src>
import jax
import jax.numpy as jnp
from jax.experimental import pallas as pl
from jax.experimental.pallas import tpu as pltpu


def _unet_block_kernel(x_ref, w1_ref, w2_ref, aff_ref, o_ref, xpad_ref, ypad_ref):
    """Fused (conv3x3 + bias + ReLU + BN-eval) x 2, lane-dense.

    x_ref:    (B, H, W*Cin)        bf16 lane-dense input rows
    w1_ref:   (3, W*Cin,  W*Cout)  bf16 band weights (one per ky)
    w2_ref:   (3, W*Cout, W*Cout)  bf16 band weights (one per ky)
    aff_ref:  (6, W*Cout)          f32 rows: b1, scale1, shift1, b2, scale2, shift2
    o_ref:    (B, H, W*Cout)       output rows (f32)
    xpad_ref: (H+2, W*Cin)         f32 scratch; rows 0 and H+1 are the zero halo
    ypad_ref: (H+2, W*Cout)        f32 scratch; rows 0 and H+1 are the zero halo
    """
    B, H, WCi = x_ref.shape
    WCo = o_ref.shape[-1]

    # Zero ONLY the two padding rows (interior is fully overwritten each n).
    xpad_ref[0:1, :] = jnp.zeros((1, WCi), jnp.float32)
    xpad_ref[H + 1:H + 2, :] = jnp.zeros((1, WCi), jnp.float32)
    ypad_ref[0:1, :] = jnp.zeros((1, WCo), jnp.float32)
    ypad_ref[H + 1:H + 2, :] = jnp.zeros((1, WCo), jnp.float32)

    # Pre-tiled full-lane affine rows, loaded once per kernel invocation.
    aff = aff_ref[...]
    b1, s1, t1 = aff[0:1, :], aff[1:2, :], aff[2:3, :]
    b2, s2, t2 = aff[3:4, :], aff[4:5, :], aff[5:6, :]

    def band_conv(pad_ref, w_ref):
        # 3 row-tap matmuls; W-direction taps/padding are inside the band mats.
        acc = jnp.dot(pad_ref[0:H, :].astype(jnp.bfloat16), w_ref[0],
                      preferred_element_type=jnp.float32)
        for ky in (1, 2):
            acc = acc + jnp.dot(pad_ref[ky:ky + H, :].astype(jnp.bfloat16),
                                w_ref[ky],
                                preferred_element_type=jnp.float32)
        return acc

    for n in range(B):          # static unroll: B is 1 (batch grid) or N (folded)
        # Layer 1: conv -> bias -> ReLU -> BN(eval) affine.
        xpad_ref[1:H + 1, :] = x_ref[n].astype(jnp.float32)
        y = band_conv(xpad_ref, w1_ref)
        y = jnp.maximum(y + b1, 0.0) * s1 + t1

        # Intermediate never leaves VMEM.
        ypad_ref[1:H + 1, :] = y

        # Layer 2: conv -> bias -> ReLU -> BN(eval) affine.
        z = band_conv(ypad_ref, w2_ref)
        z = jnp.maximum(z + b2, 0.0) * s2 + t2
        o_ref[n] = z.astype(o_ref.dtype)


def _band_weights(w_hwio, width):
    """(3, 3, Ci, Co) HWIO conv weights -> (3, width*Ci, width*Co) bf16 band mats.

    Band mat for row tap ky:  sum_kx kron(shift_kx, w[ky, kx])  where shift_kx
    is the W x W matrix with ones at (w_out + kx - 1, w_out); out-of-range
    column shifts vanish, which implements the 'same' zero padding along W.
    """
    kh, kw, ci, co = w_hwio.shape
    mats = []
    for ky in range(kh):
        m = jnp.zeros((width * ci, width * co), jnp.float32)
        for kx in range(kw):
            shift = jnp.eye(width, k=1 - kx, dtype=jnp.float32)
            m = m + jnp.kron(shift, w_hwio[ky, kx].astype(jnp.float32))
        mats.append(m)
    return jnp.stack(mats, axis=0).astype(jnp.bfloat16)


def _is_megacore():
    """Best-effort: does this chip have 2 TensorCores (v4/v5p/v7x)?"""
    try:
        kind = jax.devices()[0].device_kind.lower()
    except Exception:
        return False
    return any(tag in kind for tag in ("v4", "v5p", "v5 p", "v7"))


def unet_conv_block(x_nchw, params):
    """Full UNetConvBlock forward.  Input/output in PyTorch NCHW layout."""
    N, Cin, H, W = x_nchw.shape
    Cout = params["w1"].shape[-1]
    out_dtype = x_nchw.dtype

    # NCHW -> lane-dense (N, H, W*Cin); bf16 MXU operand halves the input DMA.
    x2d = jnp.transpose(x_nchw, (0, 2, 3, 1)).reshape(N, H, W * Cin)
    x2d = x2d.astype(jnp.bfloat16)

    wb1 = _band_weights(params["w1"], W)          # (3, W*Cin,  W*Cout)
    wb2 = _band_weights(params["w2"], W)          # (3, W*Cout, W*Cout)

    # Per-channel vectors tiled across W -> full-lane (6, W*Cout) f32 operand.
    aff = jnp.stack(
        [jnp.tile(params[k].astype(jnp.float32), W)
         for k in ("b1", "scale1", "shift1", "b2", "scale2", "shift2")],
        axis=0)

    # Per-generation grid: megacore -> one batch element per "parallel" step;
    # single TensorCore -> fold the batch into one step (no per-step tax).
    if _is_megacore() and N > 1:
        grid, bb = (N,), 1
    else:
        grid, bb = (1,), N

    y2d = pl.pallas_call(
        _unet_block_kernel,
        out_shape=jax.ShapeDtypeStruct((N, H, W * Cout), out_dtype),
        grid_spec=pltpu.PrefetchScalarGridSpec(
            num_scalar_prefetch=0,
            grid=grid,
            in_specs=[
                pl.BlockSpec((bb, H, W * Cin), lambda n: (n, 0, 0)),
                pl.BlockSpec((3, W * Cin, W * Cout), lambda n: (0, 0, 0)),
                pl.BlockSpec((3, W * Cout, W * Cout), lambda n: (0, 0, 0)),
                pl.BlockSpec((6, W * Cout), lambda n: (0, 0)),
            ],
            out_specs=pl.BlockSpec((bb, H, W * Cout), lambda n: (n, 0, 0)),
            scratch_shapes=[
                pltpu.VMEM((H + 2, W * Cin), jnp.float32),
                pltpu.VMEM((H + 2, W * Cout), jnp.float32),
            ],
        ),
        compiler_params=pltpu.CompilerParams(
            dimension_semantics=("parallel",),
        ),
    )(x2d, wb1, wb2, aff)

    # (N, H, W*Cout) is the row-major view of NHWC (N, H, W, Cout): free reshape.
    return jnp.transpose(y2d.reshape(N, H, W, Cout), (0, 3, 1, 2))


# ---------------- reference (plain JAX, f32) for correctness check ----------------
def _ref_forward(x_nchw, p_oihw):
    def conv(x, w, b):
        y = jax.lax.conv_general_dilated(
            x, w, window_strides=(1, 1), padding=((1, 1), (1, 1)),
            dimension_numbers=("NCHW", "OIHW", "NCHW"))
        return y + b[None, :, None, None]

    y = conv(x_nchw, p_oihw["w1"], p_oihw["b1"])
    y = jnp.maximum(y, 0.0)
    y = y * p_oihw["scale1"][None, :, None, None] + p_oihw["shift1"][None, :, None, None]
    y = conv(y, p_oihw["w2"], p_oihw["b2"])
    y = jnp.maximum(y, 0.0)
    y = y * p_oihw["scale2"][None, :, None, None] + p_oihw["shift2"][None, :, None, None]
    return y


if __name__ == "__main__":
    key = jax.random.PRNGKey(0)
    ks = jax.random.split(key, 12)

    N, Cin, Cout, H, W = 2, 4, 8, 16, 16
    eps = 1e-5

    x = jax.random.normal(ks[0], (N, Cin, H, W), jnp.float32)

    # Conv params (deterministic synthetic init), PyTorch OIHW layout.
    w1_oihw = jax.random.normal(ks[1], (Cout, Cin, 3, 3), jnp.float32) * 0.1
    b1 = jax.random.normal(ks[2], (Cout,), jnp.float32) * 0.1
    w2_oihw = jax.random.normal(ks[3], (Cout, Cout, 3, 3), jnp.float32) * 0.1
    b2 = jax.random.normal(ks[4], (Cout,), jnp.float32) * 0.1

    # BatchNorm (eval mode) params / running stats.
    gamma1 = 1.0 + 0.5 * jax.random.normal(ks[5], (Cout,), jnp.float32)
    beta1 = 0.1 * jax.random.normal(ks[6], (Cout,), jnp.float32)
    mean1 = 0.1 * jax.random.normal(ks[7], (Cout,), jnp.float32)
    var1 = 0.5 + jax.random.uniform(ks[8], (Cout,), jnp.float32)
    gamma2 = 1.0 + 0.5 * jax.random.normal(ks[9], (Cout,), jnp.float32)
    beta2 = 0.1 * jax.random.normal(ks[10], (Cout,), jnp.float32)
    mean2 = 0.1 * jax.random.normal(ks[11], (Cout,), jnp.float32)
    var2 = 0.5 + jax.random.uniform(ks[0], (Cout,), jnp.float32)

    scale1 = gamma1 / jnp.sqrt(var1 + eps)
    shift1 = beta1 - mean1 * scale1
    scale2 = gamma2 / jnp.sqrt(var2 + eps)
    shift2 = beta2 - mean2 * scale2

    params = {
        # kernel wrapper wants HWIO conv weights
        "w1": jnp.transpose(w1_oihw, (2, 3, 1, 0)), "b1": b1,
        "scale1": scale1, "shift1": shift1,
        "w2": jnp.transpose(w2_oihw, (2, 3, 1, 0)), "b2": b2,
        "scale2": scale2, "shift2": shift2,
    }
    params_ref = {
        "w1": w1_oihw, "b1": b1, "scale1": scale1, "shift1": shift1,
        "w2": w2_oihw, "b2": b2, "scale2": scale2, "shift2": shift2,
    }

    out = jax.jit(unet_conv_block)(x, params)
    out = jax.block_until_ready(out)

    ref = _ref_forward(x, params_ref)
    assert out.shape == (N, Cout, H, W), out.shape

    # bf16 MXU operands + f32 accumulation: expected max |err| ~2-4e-2,
    # RMS err ~5e-3 at these scales (vs O(0.5-2) for any real layout bug).
    max_err = float(jnp.max(jnp.abs(out - ref)))
    rms_err = float(jnp.sqrt(jnp.mean((out - ref) ** 2)))
    assert max_err < 0.15 and rms_err < 0.03, (max_err, rms_err)

    print("KERNEL_OK")
</pallas_src>

<mosaic_0001>
module attributes {stable_mosaic.version = 11 : i64} {
  func.func @_unet_block_kernel(%arg0: i32, %arg1: memref<2x16x64xbf16, #tpu.memory_space<vmem>>, %arg2: memref<3x64x128xbf16, #tpu.memory_space<vmem>>, %arg3: memref<3x128x128xbf16, #tpu.memory_space<vmem>>, %arg4: memref<6x128xf32, #tpu.memory_space<vmem>>, %arg5: memref<2x16x128xf32, #tpu.memory_space<vmem>>, %arg6: memref<18x64xf32, #tpu.memory_space<vmem>>, %arg7: memref<18x128xf32, #tpu.memory_space<vmem>>) attributes {dimension_semantics = [#tpu.dimension_semantics<parallel>], iteration_bounds = array<i64: 1>, scalar_prefetch = 0 : i64, scratch_operands = 2 : i64, tpu.core_type = #tpu.core_type<tc>, window_params = [{transform_indices = @transform_0, window_bounds = array<i64: 2, 16, 64>}, {pipeline_mode = #tpu.pipeline_mode<synchronous>, transform_indices = @transform_1, window_bounds = array<i64: 3, 64, 128>}, {pipeline_mode = #tpu.pipeline_mode<synchronous>, transform_indices = @transform_2, window_bounds = array<i64: 3, 128, 128>}, {pipeline_mode = #tpu.pipeline_mode<synchronous>, transform_indices = @transform_3, window_bounds = array<i64: 6, 128>}, {transform_indices = @transform_4, window_bounds = array<i64: 2, 16, 128>}]} {
    %cst = arith.constant 0.000000e+00 : f32
    %0 = vector.broadcast %cst : f32 to vector<1x64xf32>
    %c0 = arith.constant 0 : index
    %c0_0 = arith.constant 0 : index
    %1 = vector.load %arg6[%c0, %c0_0] : memref<18x64xf32, #tpu.memory_space<vmem>>, vector<1x64xf32>
    tpu.vector_store %arg6[%c0, %c0_0], %0 {strides = array<i32>} : memref<18x64xf32, #tpu.memory_space<vmem>>, vector<1x64xf32>,
    %cst_1 = arith.constant 0.000000e+00 : f32
    %2 = vector.broadcast %cst_1 : f32 to vector<1x64xf32>
    %c17 = arith.constant 17 : index
    %c0_2 = arith.constant 0 : index
    %3 = vector.load %arg6[%c17, %c0_2] : memref<18x64xf32, #tpu.memory_space<vmem>>, vector<1x64xf32>
    tpu.vector_store %arg6[%c17, %c0_2], %2 {strides = array<i32>} : memref<18x64xf32, #tpu.memory_space<vmem>>, vector<1x64xf32>,
    %cst_3 = arith.constant 0.000000e+00 : f32
    %4 = vector.broadcast %cst_3 : f32 to vector<1x128xf32>
    %c0_4 = arith.constant 0 : index
    %c0_5 = arith.constant 0 : index
    %5 = vector.load %arg7[%c0_4, %c0_5] : memref<18x128xf32, #tpu.memory_space<vmem>>, vector<1x128xf32>
    tpu.vector_store %arg7[%c0_4, %c0_5], %4 {strides = array<i32>} : memref<18x128xf32, #tpu.memory_space<vmem>>, vector<1x128xf32>,
    %cst_6 = arith.constant 0.000000e+00 : f32
    %6 = vector.broadcast %cst_6 : f32 to vector<1x128xf32>
    %c17_7 = arith.constant 17 : index
    %c0_8 = arith.constant 0 : index
    %7 = vector.load %arg7[%c17_7, %c0_8] : memref<18x128xf32, #tpu.memory_space<vmem>>, vector<1x128xf32>
    tpu.vector_store %arg7[%c17_7, %c0_8], %6 {strides = array<i32>} : memref<18x128xf32, #tpu.memory_space<vmem>>, vector<1x128xf32>,
    %c0_9 = arith.constant 0 : index
    %c0_10 = arith.constant 0 : index
    %8 = vector.load %arg4[%c0_9, %c0_10] : memref<6x128xf32, #tpu.memory_space<vmem>>, vector<6x128xf32>
    %9 = vector.extract_strided_slice %8 {offsets = [0, 0], sizes = [1, 128], strides = [1, 1]} : vector<6x128xf32> to vector<1x128xf32>
    %10 = vector.extract_strided_slice %8 {offsets = [1, 0], sizes = [1, 128], strides = [1, 1]} : vector<6x128xf32> to vector<1x128xf32>
    %11 = vector.extract_strided_slice %8 {offsets = [2, 0], sizes = [1, 128], strides = [1, 1]} : vector<6x128xf32> to vector<1x128xf32>
    %12 = vector.extract_strided_slice %8 {offsets = [3, 0], sizes = [1, 128], strides = [1, 1]} : vector<6x128xf32> to vector<1x128xf32>
    %13 = vector.extract_strided_slice %8 {offsets = [4, 0], sizes = [1, 128], strides = [1, 1]} : vector<6x128xf32> to vector<1x128xf32>
    %14 = vector.extract_strided_slice %8 {offsets = [5, 0], sizes = [1, 128], strides = [1, 1]} : vector<6x128xf32> to vector<1x128xf32>
    %c0_11 = arith.constant 0 : index
    %c0_12 = arith.constant 0 : index
    %c0_13 = arith.constant 0 : index
    %15 = vector.load %arg1[%c0_11, %c0_12, %c0_13] : memref<2x16x64xbf16, #tpu.memory_space<vmem>>, vector<1x16x64xbf16>
    %16 = vector.shape_cast %15 : vector<1x16x64xbf16> to vector<16x64xbf16>
    %17 = arith.extf %16 : vector<16x64xbf16> to vector<16x64xf32>
    %c1 = arith.constant 1 : index
    %c0_14 = arith.constant 0 : index
    %18 = vector.load %arg6[%c1, %c0_14] : memref<18x64xf32, #tpu.memory_space<vmem>>, vector<16x64xf32>
    tpu.vector_store %arg6[%c1, %c0_14], %17 {strides = array<i32>} : memref<18x64xf32, #tpu.memory_space<vmem>>, vector<16x64xf32>,
    %c0_15 = arith.constant 0 : index
    %c0_16 = arith.constant 0 : index
    %19 = vector.load %arg6[%c0_15, %c0_16] : memref<18x64xf32, #tpu.memory_space<vmem>>, vector<16x64xf32>
    %20 = arith.truncf %19 : vector<16x64xf32> to vector<16x64xbf16>
    %c0_17 = arith.constant 0 : index
    %c0_18 = arith.constant 0 : index
    %c0_19 = arith.constant 0 : index
    %21 = vector.load %arg2[%c0_17, %c0_18, %c0_19] : memref<3x64x128xbf16, #tpu.memory_space<vmem>>, vector<1x64x128xbf16>
    %22 = vector.shape_cast %21 : vector<1x64x128xbf16> to vector<64x128xbf16>
    %cst_20 = arith.constant dense<0.000000e+00> : vector<16x128xf32>
    %23 = tpu.matmul %20, %22, %cst_20 {dimension_numbers = #tpu.dot_dimension_numbers<[1], [0], [0], [1], [0, 0, 1, 1], [], []>} : vector<16x64xbf16>, vector<64x128xbf16>, vector<16x128xf32> -> vector<16x128xf32>
    %c1_21 = arith.constant 1 : index
    %c0_22 = arith.constant 0 : index
    %24 = vector.load %arg6[%c1_21, %c0_22] : memref<18x64xf32, #tpu.memory_space<vmem>>, vector<16x64xf32>
    %25 = arith.truncf %24 : vector<16x64xf32> to vector<16x64xbf16>
    %c1_23 = arith.constant 1 : index
    %c0_24 = arith.constant 0 : index
    %c0_25 = arith.constant 0 : index
    %26 = vector.load %arg2[%c1_23, %c0_24, %c0_25] : memref<3x64x128xbf16, #tpu.memory_space<vmem>>, vector<1x64x128xbf16>
    %27 = vector.shape_cast %26 : vector<1x64x128xbf16> to vector<64x128xbf16>
    %cst_26 = arith.constant dense<0.000000e+00> : vector<16x128xf32>
    %28 = tpu.matmul %25, %27, %cst_26 {dimension_numbers = #tpu.dot_dimension_numbers<[1], [0], [0], [1], [0, 0, 1, 1], [], []>} : vector<16x64xbf16>, vector<64x128xbf16>, vector<16x128xf32> -> vector<16x128xf32>
    %29 = arith.addf %23, %28 : vector<16x128xf32>
    %c2 = arith.constant 2 : index
    %c0_27 = arith.constant 0 : index
    %30 = vector.load %arg6[%c2, %c0_27] : memref<18x64xf32, #tpu.memory_space<vmem>>, vector<16x64xf32>
    %31 = arith.truncf %30 : vector<16x64xf32> to vector<16x64xbf16>
    %c2_28 = arith.constant 2 : index
    %c0_29 = arith.constant 0 : index
    %c0_30 = arith.constant 0 : index
    %32 = vector.load %arg2[%c2_28, %c0_29, %c0_30] : memref<3x64x128xbf16, #tpu.memory_space<vmem>>, vector<1x64x128xbf16>
    %33 = vector.shape_cast %32 : vector<1x64x128xbf16> to vector<64x128xbf16>
    %cst_31 = arith.constant dense<0.000000e+00> : vector<16x128xf32>
    %34 = tpu.matmul %31, %33, %cst_31 {dimension_numbers = #tpu.dot_dimension_numbers<[1], [0], [0], [1], [0, 0, 1, 1], [], []>} : vector<16x64xbf16>, vector<64x128xbf16>, vector<16x128xf32> -> vector<16x128xf32>
    %35 = arith.addf %29, %34 : vector<16x128xf32>
    %36 = vector.broadcast %9 : vector<1x128xf32> to vector<16x128xf32>
    %37 = arith.addf %35, %36 : vector<16x128xf32>
    %cst_32 = arith.constant 0.000000e+00 : f32
    %38 = vector.broadcast %cst_32 : f32 to vector<16x128xf32>
    %39 = arith.maximumf %37, %38 : vector<16x128xf32>
    %40 = vector.broadcast %10 : vector<1x128xf32> to vector<16x128xf32>
    %41 = arith.mulf %39, %40 : vector<16x128xf32>
    %42 = vector.broadcast %11 : vector<1x128xf32> to vector<16x128xf32>
    %43 = arith.addf %41, %42 : vector<16x128xf32>
    %c1_33 = arith.constant 1 : index
    %c0_34 = arith.constant 0 : index
    %44 = vector.load %arg7[%c1_33, %c0_34] : memref<18x128xf32, #tpu.memory_space<vmem>>, vector<16x128xf32>
    tpu.vector_store %arg7[%c1_33, %c0_34], %43 {strides = array<i32>} : memref<18x128xf32, #tpu.memory_space<vmem>>, vector<16x128xf32>,
    %c0_35 = arith.constant 0 : index
    %c0_36 = arith.constant 0 : index
    %45 = vector.load %arg7[%c0_35, %c0_36] : memref<18x128xf32, #tpu.memory_space<vmem>>, vector<16x128xf32>
    %46 = arith.truncf %45 : vector<16x128xf32> to vector<16x128xbf16>
    %c0_37 = arith.constant 0 : index
    %c0_38 = arith.constant 0 : index
    %c0_39 = arith.constant 0 : index
    %47 = vector.load %arg3[%c0_37, %c0_38, %c0_39] : memref<3x128x128xbf16, #tpu.memory_space<vmem>>, vector<1x128x128xbf16>
    %48 = vector.shape_cast %47 : vector<1x128x128xbf16> to vector<128x128xbf16>
    %cst_40 = arith.constant dense<0.000000e+00> : vector<16x128xf32>
    %49 = tpu.matmul %46, %48, %cst_40 {dimension_numbers = #tpu.dot_dimension_numbers<[1], [0], [0], [1], [0, 0, 1, 1], [], []>} : vector<16x128xbf16>, vector<128x128xbf16>, vector<16x128xf32> -> vector<16x128xf32>
    %c1_41 = arith.constant 1 : index
    %c0_42 = arith.constant 0 : index
    %50 = vector.load %arg7[%c1_41, %c0_42] : memref<18x128xf32, #tpu.memory_space<vmem>>, vector<16x128xf32>
    %51 = arith.truncf %50 : vector<16x128xf32> to vector<16x128xbf16>
    %c1_43 = arith.constant 1 : index
    %c0_44 = arith.constant 0 : index
    %c0_45 = arith.constant 0 : index
    %52 = vector.load %arg3[%c1_43, %c0_44, %c0_45] : memref<3x128x128xbf16, #tpu.memory_space<vmem>>, vector<1x128x128xbf16>
    %53 = vector.shape_cast %52 : vector<1x128x128xbf16> to vector<128x128xbf16>
    %cst_46 = arith.constant dense<0.000000e+00> : vector<16x128xf32>
    %54 = tpu.matmul %51, %53, %cst_46 {dimension_numbers = #tpu.dot_dimension_numbers<[1], [0], [0], [1], [0, 0, 1, 1], [], []>} : vector<16x128xbf16>, vector<128x128xbf16>, vector<16x128xf32> -> vector<16x128xf32>
    %55 = arith.addf %49, %54 : vector<16x128xf32>
    %c2_47 = arith.constant 2 : index
    %c0_48 = arith.constant 0 : index
    %56 = vector.load %arg7[%c2_47, %c0_48] : memref<18x128xf32, #tpu.memory_space<vmem>>, vector<16x128xf32>
    %57 = arith.truncf %56 : vector<16x128xf32> to vector<16x128xbf16>
    %c2_49 = arith.constant 2 : index
    %c0_50 = arith.constant 0 : index
    %c0_51 = arith.constant 0 : index
    %58 = vector.load %arg3[%c2_49, %c0_50, %c0_51] : memref<3x128x128xbf16, #tpu.memory_space<vmem>>, vector<1x128x128xbf16>
    %59 = vector.shape_cast %58 : vector<1x128x128xbf16> to vector<128x128xbf16>
    %cst_52 = arith.constant dense<0.000000e+00> : vector<16x128xf32>
    %60 = tpu.matmul %57, %59, %cst_52 {dimension_numbers = #tpu.dot_dimension_numbers<[1], [0], [0], [1], [0, 0, 1, 1], [], []>} : vector<16x128xbf16>, vector<128x128xbf16>, vector<16x128xf32> -> vector<16x128xf32>
    %61 = arith.addf %55, %60 : vector<16x128xf32>
    %62 = vector.broadcast %12 : vector<1x128xf32> to vector<16x128xf32>
    %63 = arith.addf %61, %62 : vector<16x128xf32>
    %cst_53 = arith.constant 0.000000e+00 : f32
    %64 = vector.broadcast %cst_53 : f32 to vector<16x128xf32>
    %65 = arith.maximumf %63, %64 : vector<16x128xf32>
    %66 = vector.broadcast %13 : vector<1x128xf32> to vector<16x128xf32>
    %67 = arith.mulf %65, %66 : vector<16x128xf32>
    %68 = vector.broadcast %14 : vector<1x128xf32> to vector<16x128xf32>
    %69 = arith.addf %67, %68 : vector<16x128xf32>
    %c0_54 = arith.constant 0 : index
    %c0_55 = arith.constant 0 : index
    %c0_56 = arith.constant 0 : index
    %70 = vector.load %arg5[%c0_54, %c0_55, %c0_56] : memref<2x16x128xf32, #tpu.memory_space<vmem>>, vector<1x16x128xf32>
    %71 = vector.shape_cast %70 : vector<1x16x128xf32> to vector<16x128xf32>
    %72 = vector.shape_cast %69 : vector<16x128xf32> to vector<1x16x128xf32>
    tpu.vector_store %arg5[%c0_54, %c0_55, %c0_56], %72 {strides = array<i32>} : memref<2x16x128xf32, #tpu.memory_space<vmem>>, vector<1x16x128xf32>,
    %c1_57 = arith.constant 1 : index
    %c0_58 = arith.constant 0 : index
    %c0_59 = arith.constant 0 : index
    %73 = vector.load %arg1[%c1_57, %c0_58, %c0_59] : memref<2x16x64xbf16, #tpu.memory_space<vmem>>, vector<1x16x64xbf16>
    %74 = vector.shape_cast %73 : vector<1x16x64xbf16> to vector<16x64xbf16>
    %75 = arith.extf %74 : vector<16x64xbf16> to vector<16x64xf32>
    %c1_60 = arith.constant 1 : index
    %c0_61 = arith.constant 0 : index
    %76 = vector.load %arg6[%c1_60, %c0_61] : memref<18x64xf32, #tpu.memory_space<vmem>>, vector<16x64xf32>
    tpu.vector_store %arg6[%c1_60, %c0_61], %75 {strides = array<i32>} : memref<18x64xf32, #tpu.memory_space<vmem>>, vector<16x64xf32>,
    %c0_62 = arith.constant 0 : index
    %c0_63 = arith.constant 0 : index
    %77 = vector.load %arg6[%c0_62, %c0_63] : memref<18x64xf32, #tpu.memory_space<vmem>>, vector<16x64xf32>
    %78 = arith.truncf %77 : vector<16x64xf32> to vector<16x64xbf16>
    %c0_64 = arith.constant 0 : index
    %c0_65 = arith.constant 0 : index
    %c0_66 = arith.constant 0 : index
    %79 = vector.load %arg2[%c0_64, %c0_65, %c0_66] : memref<3x64x128xbf16, #tpu.memory_space<vmem>>, vector<1x64x128xbf16>
    %80 = vector.shape_cast %79 : vector<1x64x128xbf16> to vector<64x128xbf16>
    %cst_67 = arith.constant dense<0.000000e+00> : vector<16x128xf32>
    %81 = tpu.matmul %78, %80, %cst_67 {dimension_numbers = #tpu.dot_dimension_numbers<[1], [0], [0], [1], [0, 0, 1, 1], [], []>} : vector<16x64xbf16>, vector<64x128xbf16>, vector<16x128xf32> -> vector<16x128xf32>
    %c1_68 = arith.constant 1 : index
    %c0_69 = arith.constant 0 : index
    %82 = vector.load %arg6[%c1_68, %c0_69] : memref<18x64xf32, #tpu.memory_space<vmem>>, vector<16x64xf32>
    %83 = arith.truncf %82 : vector<16x64xf32> to vector<16x64xbf16>
    %c1_70 = arith.constant 1 : index
    %c0_71 = arith.constant 0 : index
    %c0_72 = arith.constant 0 : index
    %84 = vector.load %arg2[%c1_70, %c0_71, %c0_72] : memref<3x64x128xbf16, #tpu.memory_space<vmem>>, vector<1x64x128xbf16>
    %85 = vector.shape_cast %84 : vector<1x64x128xbf16> to vector<64x128xbf16>
    %cst_73 = arith.constant dense<0.000000e+00> : vector<16x128xf32>
    %86 = tpu.matmul %83, %85, %cst_73 {dimension_numbers = #tpu.dot_dimension_numbers<[1], [0], [0], [1], [0, 0, 1, 1], [], []>} : vector<16x64xbf16>, vector<64x128xbf16>, vector<16x128xf32> -> vector<16x128xf32>
    %87 = arith.addf %81, %86 : vector<16x128xf32>
    %c2_74 = arith.constant 2 : index
    %c0_75 = arith.constant 0 : index
    %88 = vector.load %arg6[%c2_74, %c0_75] : memref<18x64xf32, #tpu.memory_space<vmem>>, vector<16x64xf32>
    %89 = arith.truncf %88 : vector<16x64xf32> to vector<16x64xbf16>
    %c2_76 = arith.constant 2 : index
    %c0_77 = arith.constant 0 : index
    %c0_78 = arith.constant 0 : index
    %90 = vector.load %arg2[%c2_76, %c0_77, %c0_78] : memref<3x64x128xbf16, #tpu.memory_space<vmem>>, vector<1x64x128xbf16>
    %91 = vector.shape_cast %90 : vector<1x64x128xbf16> to vector<64x128xbf16>
    %cst_79 = arith.constant dense<0.000000e+00> : vector<16x128xf32>
    %92 = tpu.matmul %89, %91, %cst_79 {dimension_numbers = #tpu.dot_dimension_numbers<[1], [0], [0], [1], [0, 0, 1, 1], [], []>} : vector<16x64xbf16>, vector<64x128xbf16>, vector<16x128xf32> -> vector<16x128xf32>
    %93 = arith.addf %87, %92 : vector<16x128xf32>
    %94 = vector.broadcast %9 : vector<1x128xf32> to vector<16x128xf32>
    %95 = arith.addf %93, %94 : vector<16x128xf32>
    %cst_80 = arith.constant 0.000000e+00 : f32
    %96 = vector.broadcast %cst_80 : f32 to vector<16x128xf32>
    %97 = arith.maximumf %95, %96 : vector<16x128xf32>
    %98 = vector.broadcast %10 : vector<1x128xf32> to vector<16x128xf32>
    %99 = arith.mulf %97, %98 : vector<16x128xf32>
    %100 = vector.broadcast %11 : vector<1x128xf32> to vector<16x128xf32>
    %101 = arith.addf %99, %100 : vector<16x128xf32>
    %c1_81 = arith.constant 1 : index
    %c0_82 = arith.constant 0 : index
    %102 = vector.load %arg7[%c1_81, %c0_82] : memref<18x128xf32, #tpu.memory_space<vmem>>, vector<16x128xf32>
    tpu.vector_store %arg7[%c1_81, %c0_82], %101 {strides = array<i32>} : memref<18x128xf32, #tpu.memory_space<vmem>>, vector<16x128xf32>,
    %c0_83 = arith.constant 0 : index
    %c0_84 = arith.constant 0 : index
    %103 = vector.load %arg7[%c0_83, %c0_84] : memref<18x128xf32, #tpu.memory_space<vmem>>, vector<16x128xf32>
    %104 = arith.truncf %103 : vector<16x128xf32> to vector<16x128xbf16>
    %c0_85 = arith.constant 0 : index
    %c0_86 = arith.constant 0 : index
    %c0_87 = arith.constant 0 : index
    %105 = vector.load %arg3[%c0_85, %c0_86, %c0_87] : memref<3x128x128xbf16, #tpu.memory_space<vmem>>, vector<1x128x128xbf16>
    %106 = vector.shape_cast %105 : vector<1x128x128xbf16> to vector<128x128xbf16>
    %cst_88 = arith.constant dense<0.000000e+00> : vector<16x128xf32>
    %107 = tpu.matmul %104, %106, %cst_88 {dimension_numbers = #tpu.dot_dimension_numbers<[1], [0], [0], [1], [0, 0, 1, 1], [], []>} : vector<16x128xbf16>, vector<128x128xbf16>, vector<16x128xf32> -> vector<16x128xf32>
    %c1_89 = arith.constant 1 : index
    %c0_90 = arith.constant 0 : index
    %108 = vector.load %arg7[%c1_89, %c0_90] : memref<18x128xf32, #tpu.memory_space<vmem>>, vector<16x128xf32>
    %109 = arith.truncf %108 : vector<16x128xf32> to vector<16x128xbf16>
    %c1_91 = arith.constant 1 : index
    %c0_92 = arith.constant 0 : index
    %c0_93 = arith.constant 0 : index
    %110 = vector.load %arg3[%c1_91, %c0_92, %c0_93] : memref<3x128x128xbf16, #tpu.memory_space<vmem>>, vector<1x128x128xbf16>
    %111 = vector.shape_cast %110 : vector<1x128x128xbf16> to vector<128x128xbf16>
    %cst_94 = arith.constant dense<0.000000e+00> : vector<16x128xf32>
    %112 = tpu.matmul %109, %111, %cst_94 {dimension_numbers = #tpu.dot_dimension_numbers<[1], [0], [0], [1], [0, 0, 1, 1], [], []>} : vector<16x128xbf16>, vector<128x128xbf16>, vector<16x128xf32> -> vector<16x128xf32>
    %113 = arith.addf %107, %112 : vector<16x128xf32>
    %c2_95 = arith.constant 2 : index
    %c0_96 = arith.constant 0 : index
    %114 = vector.load %arg7[%c2_95, %c0_96] : memref<18x128xf32, #tpu.memory_space<vmem>>, vector<16x128xf32>
    %115 = arith.truncf %114 : vector<16x128xf32> to vector<16x128xbf16>
    %c2_97 = arith.constant 2 : index
    %c0_98 = arith.constant 0 : index
    %c0_99 = arith.constant 0 : index
    %116 = vector.load %arg3[%c2_97, %c0_98, %c0_99] : memref<3x128x128xbf16, #tpu.memory_space<vmem>>, vector<1x128x128xbf16>
    %117 = vector.shape_cast %116 : vector<1x128x128xbf16> to vector<128x128xbf16>
    %cst_100 = arith.constant dense<0.000000e+00> : vector<16x128xf32>
    %118 = tpu.matmul %115, %117, %cst_100 {dimension_numbers = #tpu.dot_dimension_numbers<[1], [0], [0], [1], [0, 0, 1, 1], [], []>} : vector<16x128xbf16>, vector<128x128xbf16>, vector<16x128xf32> -> vector<16x128xf32>
    %119 = arith.addf %113, %118 : vector<16x128xf32>
    %120 = vector.broadcast %12 : vector<1x128xf32> to vector<16x128xf32>
    %121 = arith.addf %119, %120 : vector<16x128xf32>
    %cst_101 = arith.constant 0.000000e+00 : f32
    %122 = vector.broadcast %cst_101 : f32 to vector<16x128xf32>
    %123 = arith.maximumf %121, %122 : vector<16x128xf32>
    %124 = vector.broadcast %13 : vector<1x128xf32> to vector<16x128xf32>
    %125 = arith.mulf %123, %124 : vector<16x128xf32>
    %126 = vector.broadcast %14 : vector<1x128xf32> to vector<16x128xf32>
    %127 = arith.addf %125, %126 : vector<16x128xf32>
    %c1_102 = arith.constant 1 : index
    %c0_103 = arith.constant 0 : index
    %c0_104 = arith.constant 0 : index
    %128 = vector.load %arg5[%c1_102, %c0_103, %c0_104] : memref<2x16x128xf32, #tpu.memory_space<vmem>>, vector<1x16x128xf32>
    %129 = vector.shape_cast %128 : vector<1x16x128xf32> to vector<16x128xf32>
    %130 = vector.shape_cast %127 : vector<16x128xf32> to vector<1x16x128xf32>
    tpu.vector_store %arg5[%c1_102, %c0_103, %c0_104], %130 {strides = array<i32>} : memref<2x16x128xf32, #tpu.memory_space<vmem>>, vector<1x16x128xf32>,
    return
  }
  func.func @transform_0(%arg0: i32) -> (i32, i32, i32) {
    %c0_i32 = arith.constant 0 : i32
    %c0_i32_0 = arith.constant 0 : i32
    %c0_i32_1 = arith.constant 0 : i32
    return %arg0, %c0_i32, %c0_i32_0 : i32, i32, i32
  }
  func.func @transform_1(%arg0: i32) -> (i32, i32, i32) {
    %c0_i32 = arith.constant 0 : i32
    %c0_i32_0 = arith.constant 0 : i32
    %c0_i32_1 = arith.constant 0 : i32
    %c0_i32_2 = arith.constant 0 : i32
    return %c0_i32, %c0_i32_0, %c0_i32_1 : i32, i32, i32
  }
  func.func @transform_2(%arg0: i32) -> (i32, i32, i32) {
    %c0_i32 = arith.constant 0 : i32
    %c0_i32_0 = arith.constant 0 : i32
    %c0_i32_1 = arith.constant 0 : i32
    %c0_i32_2 = arith.constant 0 : i32
    return %c0_i32, %c0_i32_0, %c0_i32_1 : i32, i32, i32
  }
  func.func @transform_3(%arg0: i32) -> (i32, i32) {
    %c0_i32 = arith.constant 0 : i32
    %c0_i32_0 = arith.constant 0 : i32
    %c0_i32_1 = arith.constant 0 : i32
    return %c0_i32, %c0_i32_0 : i32, i32
  }
  func.func @transform_4(%arg0: i32) -> (i32, i32, i32) {
    %c0_i32 = arith.constant 0 : i32
    %c0_i32_0 = arith.constant 0 : i32
    %c0_i32_1 = arith.constant 0 : i32
    return %arg0, %c0_i32, %c0_i32_0 : i32, i32, i32
  }
}

</mosaic_0001>

<bundles_post_ra>
// kernel: tile.33
= control target key start
LH: loop header
LB: loop body
LE: loop exit
PB: predicated region body
PF: predicated region fallthrough
CT: control target
= control target key end

     0   :  { %s28_s0 = inlined_call_operand.vmem [shape: f32[8], index: 0, kind: input, shape index: {}]   ;;  %s29_s1 = inlined_call_operand.vmem [shape: f32[16,8], index: 1, kind: output, shape index: {}]  }
   0x1   :  { %v4_v0 = vld [vmem:[%s28_s0] ss:$0 sm:$0xff] }
   0x2   :  { %5 = vst [vmem:[%s29_s1] sm:$0xff] %v4_v0  ;;  %8 = vst [vmem:[%s29_s1 + $0x8] sm:$0xff] %v4_v0 }

// kernel: tile.54
= control target key start
LH: loop header
LB: loop body
LE: loop exit
PB: predicated region body
PF: predicated region fallthrough
CT: control target
= control target key end

     0   :  { %s131_s10 = smov 120   ;;  %s132_s11 = smov 104   ;;  %vm3_vm0 = vcmask 64512   ;;  %vm9_vm1 = vcmask 1048512   ;;  %vm15_vm2 = vcmask 982912   ;;  %vm21_vm3 = vcmask 917312   ;;  %s207_s0 = inlined_call_operand.vmem [shape: f32[16,8], index: 0, kind: input, shape index: {}]   ;;  %s208_s1 = inlined_call_operand.vmem [shape: f32[1,128], index: 1, kind: output, shape index: {}]  }
   0x1   :  { %v101_v0 = vld [vmem:[%s207_s0 + $0xf] sm:$0x1]   ;;  %v103_v1 = vld [vmem:[%s207_s0 + $0xd] sm:$0x1]   ;;  %v102_v2 = vld [vmem:[%s207_s0 + $0xe] sm:$0x1]  }
   0x2   :  { %7 = vrot.lane.b32.xlu0 %v101_v0, %s131_s10  ;;  %19 = vrot.lane.b32.xlu1 %v103_v1, %s132_s11  ;;  %v104_v3 = vld [vmem:[%s207_s0 + $0xc] sm:$0x1]   ;;  %s133_s16 = smov 112   ;;  %s134_s17 = smov 96   ;;  %v105_v4 = vld [vmem:[%s207_s0 + $0xb] sm:$0x1]  }
   0x3   :  { %v106_v5 = vld [vmem:[%s207_s0 + $0xa] sm:$0x1]   ;;  %v2_v6 = vld [vmem:[%s207_s0] sm:$0x1]   ;;  %s135_s24 = smov 88   ;;  %s136_s25 = smov 80  }
   0x4   :  { %4 = vst.msk [vmem:[#allocation0] sm:$0x1] %vm3_vm0, %v2_v6   ;;  %v107_v7 = vld [vmem:[%s207_s0 + $0x9] sm:$0x1]   ;;  %v108_v8 = vld [vmem:[%s207_s0 + $0x8] sm:$0x1]  }
   0x5   :  { %s137_s30 = smov 72   ;;  %s138_s2 = smov 64   ;;  %v109_v9 = vld [vmem:[%s207_s0 + $0x7] sm:$0x1]   ;;  %v110_v10 = vld [vmem:[%s207_s0 + $0x6] sm:$0x1]  }
   0x6   :  { %13 = vrot.lane.b32.xlu0 %v102_v2, %s133_s16  ;;  %25 = vrot.lane.b32.xlu1 %v104_v3, %s134_s17  ;;  %s139_s7 = smov 56   ;;  %s140_s8 = smov 48   ;;  %v111_v11 = vld [vmem:[%s207_s0 + $0x5] sm:$0x1]   ;;  %v112_v12 = vld [vmem:[%s207_s0 + $0x4] sm:$0x1]  }
   0x7   :  { %s141_s13 = smov 40   ;;  %s142_s14 = smov 32   ;;  %v113_v13 = vld [vmem:[%s207_s0 + $0x3] sm:$0x1]   ;;  %v114_v14 = vld [vmem:[%s207_s0 + $0x2] sm:$0x1]  }
   0x8   :  { %s143_s19 = smov 24   ;;  %s144_s20 = smov 16   ;;  %v115_v15 = vld [vmem:[%s207_s0 + $0x1] sm:$0x1]   ;;  %vm27_vm4 = vcmask 851712   ;;  %vm33_vm5 = vcmask 786112  }
   0x9   :  { %s145_s0 = smov 8   ;;  %vm39_vm6 = vcmask 720512   ;;  %vm45_vm7 = vcmask 654912   ;;  %vm51_vm8 = vcmask 589312   ;;  %vm57_vm9 = vcmask 523712  }
   0xa   :  { %31 = vrot.lane.b32.xlu0 %v105_v4, %s135_s24  ;;  %37 = vrot.lane.b32.xlu1 %v106_v5, %s136_s25  ;;  %vm63_vm10 = vcmask 458112   ;;  %vm69_vm11 = vcmask 392512   ;;  %vm75_vm12 = vcmask 326912   ;;  %vm81_vm13 = vcmask 261312  }
   0xb   :  { %vm87_vm14 = vcmask 195712   ;;  %vm93_vm15 = vcmask 130112  }
   0xe   :  { %43 = vrot.lane.b32.xlu0 %v107_v7, %s137_s30  ;;  %49 = vrot.lane.b32.xlu1 %v108_v8, %s138_s2 }
  0x12   :  { %55 = vrot.lane.b32.xlu0 %v109_v9, %s139_s7  ;;  %61 = vrot.lane.b32.xlu1 %v110_v10, %s140_s8 }
  0x16   :  { %67 = vrot.lane.b32.xlu0 %v111_v11, %s141_s13  ;;  %73 = vrot.lane.b32.xlu1 %v112_v12, %s142_s14 }
  0x1a   :  { %79 = vrot.lane.b32.xlu0 %v113_v13, %s143_s19  ;;  %85 = vrot.lane.b32.xlu1 %v114_v14, %s144_s20 }
  0x1e   :  { %91 = vrot.lane.b32.xlu0 %v115_v15, %s145_s0 }
  0x74   :  { %v8_v16 = vpop.permute.xlu0 %7   ;;  %v20_v17 = vpop.permute.xlu1 %19  }
  0x75   :  { %10 = vst.msk [vmem:[#allocation0] sm:$0x1] %vm9_vm1, %v8_v16  }
  0x78   :  { %v14_v18 = vpop.permute.xlu0 %13   ;;  %v26_v19 = vpop.permute.xlu1 %25  }
  0x79   :  { %16 = vst.msk [vmem:[#allocation0] sm:$0x1] %vm15_vm2, %v14_v18  }
  0x7a   :  { %22 = vst.msk [vmem:[#allocation0] sm:$0x1] %vm21_vm3, %v20_v17  }
  0x7b   :  { %28 = vst.msk [vmem:[#allocation0] sm:$0x1] %vm27_vm4, %v26_v19  }
  0x7c   :  { %v32_v20 = vpop.permute.xlu0 %31   ;;  %v38_v21 = vpop.permute.xlu1 %37  }
  0x7d   :  { %34 = vst.msk [vmem:[#allocation0] sm:$0x1] %vm33_vm5, %v32_v20  }
  0x7e   :  { %40 = vst.msk [vmem:[#allocation0] sm:$0x1] %vm39_vm6, %v38_v21  }
  0x80   :  { %v44_v22 = vpop.permute.xlu0 %43   ;;  %v50_v23 = vpop.permute.xlu1 %49  }
  0x81   :  { %46 = vst.msk [vmem:[#allocation0] sm:$0x1] %vm45_vm7, %v44_v22  }
  0x82   :  { %52 = vst.msk [vmem:[#allocation0] sm:$0x1] %vm51_vm8, %v50_v23  }
  0x84   :  { %v56_v24 = vpop.permute.xlu0 %55   ;;  %v62_v25 = vpop.permute.xlu1 %61  }
  0x85   :  { %58 = vst.msk [vmem:[#allocation0] sm:$0x1] %vm57_vm9, %v56_v24  }
  0x86   :  { %64 = vst.msk [vmem:[#allocation0] sm:$0x1] %vm63_vm10, %v62_v25  }
  0x88   :  { %v68_v26 = vpop.permute.xlu0 %67   ;;  %v74_v27 = vpop.permute.xlu1 %73  }
  0x89   :  { %70 = vst.msk [vmem:[#allocation0] sm:$0x1] %vm69_vm11, %v68_v26  }
  0x8a   :  { %76 = vst.msk [vmem:[#allocation0] sm:$0x1] %vm75_vm12, %v74_v27  }
  0x8c   :  { %v80_v28 = vpop.permute.xlu0 %79   ;;  %v86_v29 = vpop.permute.xlu1 %85  }
  0x8d   :  { %82 = vst.msk [vmem:[#allocation0] sm:$0x1] %vm81_vm13, %v80_v28  }
  0x8e   :  { %88 = vst.msk [vmem:[#allocation0] sm:$0x1] %vm87_vm14, %v86_v29  }
  0x90   :  { %v92_v30 = vpop.permute.xlu0 %91  }
  0x91   :  { %94 = vst.msk [vmem:[#allocation0] sm:$0x1] %vm93_vm15, %v92_v30  }
  0x98   :  { %v98_v31 = vld [vmem:[#allocation0] sm:$0x1] }
  0x99   :  { %100 = vst [vmem:[%s208_s1] sm:$0x1] %v98_v31 }

// kernel: unet_conv_block.1
= control target key start
LH: loop header
LB: loop body
LE: loop exit
PB: predicated region body
PF: predicated region fallthrough
CT: control target
= control target key end

     0   :  { %vm18_vm0 = vcmask 516096   ;;  %v1778_v0 = vmov 0.0   ;;  %vm1779_vm1 = vmmov 0   ;;  %vm28_vm2 = vcmask 523264   ;;  %s2204_s1 = inlined_call_operand.vmem [shape: bf16[3,64,128], index: 1, kind: input, shape index: {}]   ;;  %s2205_s0 = inlined_call_operand.vmem [shape: bf16[2,16,64], index: 0, kind: input, shape index: {}]   ;;  %s2206_s2 = inlined_call_operand.vmem [shape: bf16[3,128,128], index: 2, kind: input, shape index: {}]   ;;  %s2207_s3 = inlined_call_operand.vmem [shape: f32[6,128], index: 3, kind: input, shape index: {}]   ;;  %s2208_s4 = inlined_call_operand.vmem [shape: f32[2,16,128], index: 4, kind: output, shape index: {}]  }
   0x1   :  { %1512 = vmatprep.subr.bf16.mxu1 %v1778_v0  ;;  %21 = vst [vmem:[#allocation3] sm:$0x1] %v1778_v0  ;;  %22 = vst [vmem:[#allocation3 + $0x11] sm:$0x1] %v1778_v0  ;;  %v1706_v1 = vld [vmem:[%s2204_s1 + $0x20] sm:$0xff]   ;;  %1520 = vmatprep.mubr.msk.bf16.mxu1 %vm1779_vm1, %v1778_v0  ;;  %v1707_v2 = vld [vmem:[%s2204_s1 + $0x28] sm:$0xff]   ;;  %v272_v49 = vlaneseq }
   0x2   :  { %19 = vst.msk [vmem:[#allocation2] sm:$0x1] %vm18_vm0, %v1778_v0  ;;  %20 = vst.msk [vmem:[#allocation2 + $0x11] sm:$0x1] %vm18_vm0, %v1778_v0  ;;  %1536 = vmatprep.subr.bf16.mxu0 %v1778_v0  ;;  %1544 = vmatprep.mubr.msk.bf16.mxu0 %vm1779_vm1, %v1778_v0  ;;  %v1420_v3 = vld [vmem:[%s2205_s0] sm:$0xff]   ;;  %v1708_v7 = vld [vmem:[%s2204_s1 + $0x30] sm:$0xff]  }
   0x3   :  { %1513 = vmatpush3.bf16.msra.mxu1 %v1706_v1  ;;  %v1421_v4 = vunpack.c.l.bf16 %v1420_v3  ;;  %v1422_v5 = vunpack.c.h.bf16 %v1420_v3  ;;  %v1710_v6 = vld [vmem:[%s2204_s1 + $0x40] sm:$0xff]   ;;  %v1712_v8 = vld [vmem:[%s2204_s1 + $0x48] sm:$0xff]   ;;  %v1709_v10 = vld [vmem:[%s2204_s1 + $0x38] sm:$0xff]   ;;  %v1946_v53 = vshrl.u32 %v272_v49, 7 }
   0x4   :  { %1514 = vmatprep.subr.bf16.mxu1 %v1778_v0  ;;  %1537 = vmatpush3.bf16.msra.mxu0 %v1710_v6  ;;  %v1427_v9 = vld [vmem:[%s2205_s0 + $0x8] sm:$0xff]   ;;  %v1714_v11 = vld [vmem:[%s2204_s1 + $0x50] sm:$0xff]   ;;  %v1711_v14 = vld [vmem:[%s2204_s1] sm:$0xff]  }
   0x5   :  { %29 = vst.msk [vmem:[#allocation2 + $0x1] sm:$0xff] %vm28_vm2, %v1421_v4  ;;  %30 = vst.msk [vmem:[#allocation2 + $0x9] sm:$0xff] %vm28_vm2, %v1422_v5  ;;  %1538 = vmatprep.subr.bf16.mxu0 %v1778_v0  ;;  %v1425_v12 = vunpack.c.l.bf16 %v1427_v9  ;;  %v1426_v13 = vunpack.c.h.bf16 %v1427_v9  ;;  %v1716_v15 = vld [vmem:[%s2204_s1 + $0x58] sm:$0xff]   ;;  %v1713_v23 = vld [vmem:[%s2204_s1 + $0x8] sm:$0xff]   ;;  %v274_v54 = vsub.s32 0, %v1946_v53  ;;  %v282_v59 = vsub.s32 1, %v1946_v53 }
   0x6   :  { %v1715_v25 = vld [vmem:[%s2204_s1 + $0x10] sm:$0xff]   ;;  %v1717_v26 = vld [vmem:[%s2204_s1 + $0x18] sm:$0xff]   ;;  %v1718_v28 = vld [vmem:[%s2206_s2 + $0x40] sm:$0xff]   ;;  %v288_v63 = vsub.s32 2, %v1946_v53 }
   0x7   :  { %1515 = vmatpush3.bf16.msra.mxu1 %v1707_v2  ;;  %v1719_v29 = vld [vmem:[%s2206_s2] sm:$0xff]   ;;  %v1720_v30 = vld [vmem:[%s2206_s2 + $0x48] sm:$0xff]   ;;  %v1722_v32 = vld [vmem:[%s2206_s2 + $0x50] sm:$0xff]  }
   0x8   :  { %1516 = vmatprep.subr.bf16.mxu1 %v1778_v0  ;;  %1539 = vmatpush3.bf16.msra.mxu0 %v1712_v8  ;;  %v1721_v31 = vld [vmem:[%s2206_s2 + $0x8] sm:$0xff]   ;;  %v1724_v33 = vld [vmem:[%s2206_s2 + $0x58] sm:$0xff]   ;;  %v1723_v34 = vld [vmem:[%s2206_s2 + $0x10] sm:$0xff]  }
   0x9   :  { %1540 = vmatprep.subr.bf16.mxu0 %v1778_v0  ;;  %v1726_v35 = vld [vmem:[%s2206_s2 + $0x60] sm:$0xff]   ;;  %v1725_v36 = vld [vmem:[%s2206_s2 + $0x18] sm:$0xff]   ;;  %v1728_v37 = vld [vmem:[%s2206_s2 + $0x68] sm:$0xff]  }
   0xa   :  { %v1727_v38 = vld [vmem:[%s2206_s2 + $0x20] sm:$0xff]   ;;  %v1730_v39 = vld [vmem:[%s2206_s2 + $0x70] sm:$0xff]   ;;  %v1729_v40 = vld [vmem:[%s2206_s2 + $0x28] sm:$0xff]  }
   0xb   :  { %1517 = vmatpush3.bf16.msra.mxu1 %v1708_v7  ;;  %v1732_v41 = vld [vmem:[%s2206_s2 + $0x78] sm:$0xff]   ;;  %v1731_v42 = vld [vmem:[%s2206_s2 + $0x30] sm:$0xff]   ;;  %v1952_v55 = vld [vmem:[%s2207_s3] sm:$0x3f] }
   0xc   :  { %1518 = vmatprep.subr.bf16.mxu1 %v1778_v0  ;;  %v42_v16 = vld [vmem:[#allocation2 + $0x1] sm:$0xff]  ;;  %v43_v17 = vld [vmem:[#allocation2 + $0x9] sm:$0xff]  ;;  %1541 = vmatpush3.bf16.msra.mxu0 %v1714_v11  ;;  %v1733_v43 = vld [vmem:[%s2206_s2 + $0x38] sm:$0xff]   ;;  %v1955_v58 = vrot.slane %v1952_v55, %v274_v54  ;;  %v1961_v4 = vrot.slane %v1952_v55, %v282_v59  ;;  %v1964_v7 = vrot.slane %v1952_v55, %v288_v63 }
   0xd   :  { %v190_v18 = vld [vmem:[#allocation2 + $0x2] sm:$0xff]  ;;  %v44_v19 = vpack.c.bf16 %v43_v17, %v42_v16  ;;  %v191_v20 = vld [vmem:[#allocation2 + $0xa] sm:$0xff]  ;;  %1542 = vmatprep.subr.bf16.mxu0 %v1778_v0 }
   0xe   :  { %v31_v21 = vld [vmem:[#allocation2] sm:$0xff]  ;;  %v32_v22 = vld [vmem:[#allocation2 + $0x8] sm:$0xff]  ;;  %v192_v24 = vpack.c.bf16 %v191_v20, %v190_v18  ;;  %v1738_v20 = vld [vmem:[%s2206_s2 + $0x90] sm:$0xff]  }
   0xf   :  { %1519 = vmatpush3.bf16.msra.mxu1 %v1709_v10  ;;  %649 = vst.msk [vmem:[#allocation2 + $0x1] sm:$0xff] %vm28_vm2, %v1425_v12  ;;  %650 = vst.msk [vmem:[#allocation2 + $0x9] sm:$0xff] %vm28_vm2, %v1426_v13  ;;  %v33_v27 = vpack.c.bf16 %v32_v22, %v31_v21  ;;  %v1736_v16 = vld [vmem:[%s2206_s2 + $0x88] sm:$0xff]   ;;  %v1735_v17 = vld [vmem:[%s2204_s1 + $0x20] sm:$0xff]  }
  0x10   :  { %1524 = vmatprep.subr.bf16.mxu1 %v1778_v0  ;;  %1543 = vmatpush3.bf16.msra.mxu0 %v1716_v15  ;;  %v1737_v22 = vld [vmem:[%s2204_s1 + $0x28] sm:$0xff]   ;;  %v1755_v54 = vld [vmem:[%s2206_s2] sm:$0xff]   ;;  %v1766_v63 = vld [vmem:[%s2206_s2 + $0x70] sm:$0xff]  }
  0x11   :  { %1568 = vmatprep.subr.bf16.mxu0 %v1778_v0  ;;  %v1762_v59 = vld [vmem:[%s2206_s2 + $0x60] sm:$0xff]  }
  0x12   :  { %1521 = vmatmul.mubr.msk.bf16.vlgmr.msra.gmra.mrb[0].mxu1 %vm28_vm2, %v44_v19 }
  0x13   :  { %1525 = vmatpush3.bf16.msra.mxu1 %v1711_v14  ;;  %1532 = vmatprep.mubr.msk.bf16.mxu1 %vm1779_vm1, %v1778_v0  ;;  %v1734_v14 = vld [vmem:[%s2206_s2 + $0x80] sm:$0xff]  }
  0x14   :  { %1526 = vmatprep.subr.bf16.mxu1 %v1778_v0  ;;  %1545 = vmatmul.mubr.msk.bf16.vlgmr.msra.gmra.mrb[0].mxu0 %vm28_vm2, %v192_v24  ;;  %v1739_v24 = vld [vmem:[%s2204_s1 + $0x30] sm:$0xff]  }
  0x15   :  { %1584 = vmatprep.mubr.msk.bf16.mxu0 %vm1779_vm1, %v1778_v0  ;;  %1569 = vmatpush3.bf16.msra.mxu0 %v1719_v29  ;;  %v1744_v29 = vld [vmem:[%s2206_s2 + $0xa8] sm:$0xff]  }
  0x16   :  { %1570 = vmatprep.subr.bf16.mxu0 %v1778_v0 }
  0x17   :  { %1527 = vmatpush3.bf16.msra.mxu1 %v1713_v23  ;;  %v1740_v23 = vld [vmem:[%s2206_s2 + $0x98] sm:$0xff]  }
  0x18   :  { %1528 = vmatprep.subr.bf16.mxu1 %v1778_v0 }
  0x19   :  { %1571 = vmatpush3.bf16.msra.mxu0 %v1721_v31  ;;  %v1743_v31 = vld [vmem:[%s2204_s1] sm:$0xff]  }
  0x1a   :  { %1572 = vmatprep.subr.bf16.mxu0 %v1778_v0 }
  0x1b   :  { %1529 = vmatpush3.bf16.msra.mxu1 %v1715_v25  ;;  %v1742_v25 = vld [vmem:[%s2206_s2 + $0xa0] sm:$0xff]  }
  0x1c   :  { %1530 = vmatprep.subr.bf16.mxu1 %v1778_v0 }
  0x1d   :  { %1573 = vmatpush3.bf16.msra.mxu0 %v1723_v34  ;;  %v1748_v34 = vld [vmem:[%s2206_s2 + $0xb8] sm:$0xff]  }
  0x1e   :  { %1574 = vmatprep.subr.bf16.mxu0 %v1778_v0 }
  0x1f   :  { %1531 = vmatpush3.bf16.msra.mxu1 %v1717_v26  ;;  %v1741_v26 = vld [vmem:[%s2204_s1 + $0x38] sm:$0xff]  }
  0x20   :  { %1548 = vmatprep.subr.bf16.mxu1 %v1778_v0 }
  0x21   :  { %1575 = vmatpush3.bf16.msra.mxu0 %v1725_v36 }
  0x22   :  { %1533 = vmatmul.mubr.msk.bf16.vlgmr.msra.gmra.mrb[4].mxu1 %vm28_vm2, %v33_v27  ;;  %1576 = vmatprep.subr.bf16.mxu0 %v1778_v0  ;;  %v662_v27 = vld [vmem:[#allocation2 + $0x1] sm:$0xff] }
  0x23   :  { %1564 = vmatprep.mubr.msk.bf16.mxu1 %vm1779_vm1, %v1778_v0  ;;  %1549 = vmatpush3.bf16.msra.mxu1 %v1718_v28  ;;  %v663_v28 = vld [vmem:[#allocation2 + $0x9] sm:$0xff] }
  0x24   :  { %1550 = vmatprep.subr.bf16.mxu1 %v1778_v0 }
  0x25   :  { %1577 = vmatpush3.bf16.msra.mxu0 %v1727_v38  ;;  %v1750_v38 = vld [vmem:[%s2204_s1 + $0x40] sm:$0xff]  }
  0x26   :  { %1578 = vmatprep.subr.bf16.mxu0 %v1778_v0 }
  0x27   :  { %1551 = vmatpush3.bf16.msra.mxu1 %v1720_v30  ;;  %v664_v30 = vpack.c.bf16 %v663_v28, %v662_v27  ;;  %v638_v27 = vsub.s32 5, %v1946_v53 }
  0x28   :  { %1552 = vmatprep.subr.bf16.mxu1 %v1778_v0 }
  0x29   :  { %1579 = vmatpush3.bf16.msra.mxu0 %v1729_v40  ;;  %v1749_v40 = vld [vmem:[%s2204_s1 + $0x18] sm:$0xff]  }
  0x2a   :  { %1580 = vmatprep.subr.bf16.mxu0 %v1778_v0 }
  0x2b   :  { %1553 = vmatpush3.bf16.msra.mxu1 %v1722_v32  ;;  %v1746_v32 = vld [vmem:[%s2206_s2 + $0xb0] sm:$0xff]  }
  0x2c   :  { %1554 = vmatprep.subr.bf16.mxu1 %v1778_v0 }
  0x2d   :  { %1581 = vmatpush3.bf16.msra.mxu0 %v1731_v42  ;;  %v652_v42 = vld [vmem:[#allocation2 + $0x8] sm:$0xff] }
  0x2e   :  { %1582 = vmatprep.subr.bf16.mxu0 %v1778_v0 }
  0x2f   :  { %1555 = vmatpush3.bf16.msra.mxu1 %v1724_v33  ;;  %v1745_v33 = vld [vmem:[%s2204_s1 + $0x8] sm:$0xff]  }
  0x30   :  { %1556 = vmatprep.subr.bf16.mxu1 %v1778_v0 }
  0x31   :  { %1583 = vmatpush3.bf16.msra.mxu0 %v1733_v43  ;;  %v1751_v43 = vld [vmem:[%s2204_s1 + $0x48] sm:$0xff]  }
  0x32   :  { %1608 = vmatprep.subr.bf16.mxu0 %v1778_v0 }
  0x33   :  { %1557 = vmatpush3.bf16.msra.mxu1 %v1726_v35 }
  0x34   :  { %1558 = vmatprep.subr.bf16.mxu1 %v1778_v0 }
  0x37   :  { %1559 = vmatpush3.bf16.msra.mxu1 %v1728_v37  ;;  %v1747_v37 = vld [vmem:[%s2204_s1 + $0x10] sm:$0xff]  }
  0x38   :  { %1560 = vmatprep.subr.bf16.mxu1 %v1778_v0 }
  0x3b   :  { %1561 = vmatpush3.bf16.msra.mxu1 %v1730_v39 }
  0x3c   :  { %1562 = vmatprep.subr.bf16.mxu1 %v1778_v0 }
  0x3f   :  { %1563 = vmatpush3.bf16.msra.mxu1 %v1732_v41  ;;  %v651_v41 = vld [vmem:[#allocation2] sm:$0xff] }
  0x40   :  { %1588 = vmatprep.subr.bf16.mxu1 %v1778_v0 }
  0xe5   :  { %v115_v44 = vpop.f32.mrb[0].mxu1 }
  0xe6   :  { %v1522_v45 = vpop.f32.mrb[1].mxu1 }
  0xe7   :  { %v118_v46 = vpop.f32.mrb[2].mxu1  ;;  %v263_v48 = vpop.f32.mrb[0].mxu0  ;;  %v1752_v45 = vld [vmem:[%s2204_s1 + $0x50] sm:$0xff]  }
  0xe8   :  { %v1523_v47 = vpop.f32.mrb[3].mxu1  ;;  %v1546_v50 = vpop.f32.mrb[1].mxu0 }
  0xe9   :  { %v266_v51 = vpop.f32.mrb[2].mxu0  ;;  %v809_v47 = vld [vmem:[#allocation2 + $0x2] sm:$0xff] }
  0xea   :  { %v1547_v52 = vpop.f32.mrb[3].mxu0  ;;  %v1754_v50 = vld [vmem:[%s2206_s2 + $0x40] sm:$0xff]  }
  0xeb   :  { %v1758_v52 = vld [vmem:[%s2206_s2 + $0x50] sm:$0xff]  }
  0xf5   :  { %v183_v56 = vpop.f32.mrb[4].mxu1 }
  0xf6   :  { %v184_v57 = vadd.f32 %v183_v56, %v115_v44  ;;  %v1534_v60 = vpop.f32.mrb[5].mxu1  ;;  %v653_v44 = vpack.c.bf16 %v652_v42, %v651_v41  ;;  %v1760_v56 = vld [vmem:[%s2206_s2 + $0x58] sm:$0xff]  }
  0xf7   :  { %v186_v61 = vpop.f32.mrb[6].mxu1  ;;  %v1759_v60 = vld [vmem:[%s2206_s2 + $0x10] sm:$0xff]  }
  0xf8   :  { %v270_v62 = vadd.f32 %v263_v48, %v184_v57  ;;  %v187_v1 = vadd.f32 %v186_v61, %v118_v46  ;;  %v1535_v2 = vpop.f32.mrb[7].mxu1  ;;  %v1753_v46 = vld [vmem:[%s2204_s1 + $0x58] sm:$0xff]   ;;  %v810_v48 = vld [vmem:[#allocation2 + $0xa] sm:$0xff] }
  0xf9   :  { %v811_v49 = vpack.c.bf16 %v810_v48, %v809_v47  ;;  %v1757_v57 = vld [vmem:[%s2206_s2 + $0x8] sm:$0xff]   ;;  %v1768_v2 = vld [vmem:[%s2206_s2 + $0x78] sm:$0xff]  }
  0xfa   :  { %v276_v3 = vadd.f32 %v1955_v58, %v270_v62  ;;  %v271_v5 = vadd.f32 %v266_v51, %v187_v1  ;;  %v1756_v51 = vld [vmem:[%s2206_s2 + $0x48] sm:$0xff]   ;;  %v1761_v62 = vld [vmem:[%s2206_s2 + $0x18] sm:$0xff]   ;;  %v1763_v1 = vld [vmem:[%s2206_s2 + $0x20] sm:$0xff]  }
  0xfb   :  { %v1764_v61 = vld [vmem:[%s2206_s2 + $0x68] sm:$0xff]  }
  0xfc   :  { %v278_v6 = vmax.f32 %v276_v3, 0.0  ;;  %v277_v8 = vadd.f32 %v1955_v58, %v271_v5  ;;  %v1765_v3 = vld [vmem:[%s2206_s2 + $0x28] sm:$0xff]   ;;  %v1767_v5 = vld [vmem:[%s2206_s2 + $0x30] sm:$0xff]  }
  0xfe   :  { %v284_v9 = vmul.f32 %v1961_v4, %v278_v6  ;;  %v279_v10 = vmax.f32 %v277_v8, 0.0  ;;  %v1769_v6 = vld [vmem:[%s2206_s2 + $0x38] sm:$0xff]  }
 0x100   :  { %v290_v11 = vadd.f32 %v1964_v7, %v284_v9  ;;  %v285_v12 = vmul.f32 %v1961_v4, %v279_v10 }
 0x102   :  { %292 = vst [vmem:[#allocation3 + $0x1] sm:$0xff] %v290_v11  ;;  %v291_v13 = vadd.f32 %v1964_v7, %v285_v12 }
 0x104   :  { %293 = vst [vmem:[#allocation3 + $0x9] sm:$0xff] %v291_v13  ;;  %v315_v15 = vpack.c.bf16 %v291_v13, %v290_v11 }
 0x106   :  { %1565 = vmatmul.mubr.bf16.vlgmr.msra.gmra.mrb[8].mxu1 %v315_v15 }
 0x107   :  { %1589 = vmatpush3.bf16.msra.mxu1 %v1734_v14  ;;  %1604 = vmatprep.mubr.msk.bf16.mxu1 %vm1779_vm1, %v1778_v0 }
 0x108   :  { %1590 = vmatprep.subr.bf16.mxu1 %v1778_v0 }
 0x109   :  { %v294_v18 = vld [vmem:[#allocation3] sm:$0xff] }
 0x10b   :  { %v295_v19 = vld [vmem:[#allocation3 + $0x8] sm:$0xff]  ;;  %1591 = vmatpush3.bf16.msra.mxu1 %v1736_v16 }
 0x10c   :  { %v296_v21 = vpack.c.bf16 %v295_v19, %v294_v18  ;;  %1592 = vmatprep.subr.bf16.mxu1 %v1778_v0  ;;  %v511_v35 = vld [vmem:[#allocation3 + $0x2] sm:$0xff]  ;;  %v512_v36 = vld [vmem:[#allocation3 + $0xa] sm:$0xff] }
 0x10d   :  { %v513_v39 = vpack.c.bf16 %v512_v36, %v511_v35  ;;  %v2140_v35 = vrot.slane %v1952_v55, %v638_v27 }
 0x10e   :  { %1585 = vmatmul.mubr.bf16.vlgmr.msra.gmra.mrb[4].mxu0 %v296_v21 }
 0x10f   :  { %1609 = vmatpush3.bf16.msra.mxu0 %v1735_v17  ;;  %1593 = vmatpush3.bf16.msra.mxu1 %v1738_v20 }
 0x110   :  { %1610 = vmatprep.subr.bf16.mxu0 %v1778_v0  ;;  %1594 = vmatprep.subr.bf16.mxu1 %v1778_v0 }
 0x111   :  { %1616 = vmatprep.mubr.msk.bf16.mxu0 %vm1779_vm1, %v1778_v0 }
 0x113   :  { %1611 = vmatpush3.bf16.msra.mxu0 %v1737_v22  ;;  %1595 = vmatpush3.bf16.msra.mxu1 %v1740_v23  ;;  %v624_v22 = vsub.s32 3, %v1946_v53 }
 0x114   :  { %1612 = vmatprep.subr.bf16.mxu0 %v1778_v0  ;;  %1596 = vmatprep.subr.bf16.mxu1 %v1778_v0 }
 0x115   :  { %v2131_v23 = vrot.slane %v1952_v55, %v624_v22 }
 0x117   :  { %1613 = vmatpush3.bf16.msra.mxu0 %v1739_v24  ;;  %1597 = vmatpush3.bf16.msra.mxu1 %v1742_v25  ;;  %v632_v24 = vsub.s32 4, %v1946_v53 }
 0x118   :  { %1614 = vmatprep.subr.bf16.mxu0 %v1778_v0  ;;  %1598 = vmatprep.subr.bf16.mxu1 %v1778_v0 }
 0x11b   :  { %1615 = vmatpush3.bf16.msra.mxu0 %v1741_v26  ;;  %1599 = vmatpush3.bf16.msra.mxu1 %v1744_v29 }
 0x11c   :  { %1620 = vmatprep.subr.bf16.mxu0 %v1778_v0  ;;  %1600 = vmatprep.subr.bf16.mxu1 %v1778_v0 }
 0x11e   :  { %1617 = vmatmul.mubr.msk.bf16.vlgmr.msra.gmra.mrb[8].mxu0 %vm28_vm2, %v664_v30 }
 0x11f   :  { %1621 = vmatpush3.bf16.msra.mxu0 %v1743_v31  ;;  %1601 = vmatpush3.bf16.msra.mxu1 %v1746_v32  ;;  %v2137_v31 = vrot.slane %v1952_v55, %v632_v24 }
 0x120   :  { %1622 = vmatprep.subr.bf16.mxu0 %v1778_v0  ;;  %1602 = vmatprep.subr.bf16.mxu1 %v1778_v0 }
 0x121   :  { %1628 = vmatprep.mubr.msk.bf16.mxu0 %vm1779_vm1, %v1778_v0 }
 0x123   :  { %1623 = vmatpush3.bf16.msra.mxu0 %v1745_v33  ;;  %1603 = vmatpush3.bf16.msra.mxu1 %v1748_v34 }
 0x124   :  { %1624 = vmatprep.subr.bf16.mxu0 %v1778_v0  ;;  %1632 = vmatprep.subr.bf16.mxu1 %v1778_v0 }
 0x126   :  { %1605 = vmatmul.mubr.bf16.vlgmr.msra.gmra.mrb[12].mxu1 %v513_v39 }
 0x127   :  { %1625 = vmatpush3.bf16.msra.mxu0 %v1747_v37  ;;  %1633 = vmatpush3.bf16.msra.mxu1 %v1750_v38 }
 0x128   :  { %1626 = vmatprep.subr.bf16.mxu0 %v1778_v0  ;;  %1634 = vmatprep.subr.bf16.mxu1 %v1778_v0 }
 0x129   :  { %1640 = vmatprep.mubr.msk.bf16.mxu1 %vm1779_vm1, %v1778_v0 }
 0x12b   :  { %1627 = vmatpush3.bf16.msra.mxu0 %v1749_v40  ;;  %1635 = vmatpush3.bf16.msra.mxu1 %v1751_v43 }
 0x12c   :  { %1636 = vmatprep.subr.bf16.mxu1 %v1778_v0  ;;  %1644 = vmatprep.subr.bf16.mxu0 %v1778_v0 }
 0x12e   :  { %1629 = vmatmul.mubr.msk.bf16.vlgmr.msra.gmra.mrb[12].mxu0 %vm28_vm2, %v653_v44 }
 0x12f   :  { %1637 = vmatpush3.bf16.msra.mxu1 %v1752_v45  ;;  %1660 = vmatprep.mubr.msk.bf16.mxu0 %vm1779_vm1, %v1778_v0 }
 0x130   :  { %1638 = vmatprep.subr.bf16.mxu1 %v1778_v0  ;;  %1645 = vmatpush3.bf16.msra.mxu0 %v1754_v50 }
 0x131   :  { %1646 = vmatprep.subr.bf16.mxu0 %v1778_v0 }
 0x133   :  { %1639 = vmatpush3.bf16.msra.mxu1 %v1753_v46 }
 0x134   :  { %1664 = vmatprep.subr.bf16.mxu1 %v1778_v0  ;;  %1647 = vmatpush3.bf16.msra.mxu0 %v1756_v51 }
 0x135   :  { %1648 = vmatprep.subr.bf16.mxu0 %v1778_v0 }
 0x136   :  { %1641 = vmatmul.mubr.msk.bf16.vlgmr.msra.gmra.mrb[16].mxu1 %vm28_vm2, %v811_v49 }
 0x137   :  { %1680 = vmatprep.mubr.msk.bf16.mxu1 %vm1779_vm1, %v1778_v0  ;;  %1665 = vmatpush3.bf16.msra.mxu1 %v1755_v54 }
 0x138   :  { %1649 = vmatpush3.bf16.msra.mxu0 %v1758_v52  ;;  %1666 = vmatprep.subr.bf16.mxu1 %v1778_v0 }
 0x139   :  { %1650 = vmatprep.subr.bf16.mxu0 %v1778_v0 }
 0x13b   :  { %1667 = vmatpush3.bf16.msra.mxu1 %v1757_v57 }
 0x13c   :  { %1651 = vmatpush3.bf16.msra.mxu0 %v1760_v56  ;;  %1668 = vmatprep.subr.bf16.mxu1 %v1778_v0 }
 0x13d   :  { %1652 = vmatprep.subr.bf16.mxu0 %v1778_v0 }
 0x13f   :  { %1669 = vmatpush3.bf16.msra.mxu1 %v1759_v60 }
 0x140   :  { %1653 = vmatpush3.bf16.msra.mxu0 %v1762_v59  ;;  %1670 = vmatprep.subr.bf16.mxu1 %v1778_v0 }
 0x141   :  { %1654 = vmatprep.subr.bf16.mxu0 %v1778_v0 }
 0x143   :  { %1671 = vmatpush3.bf16.msra.mxu1 %v1761_v62 }
 0x144   :  { %1655 = vmatpush3.bf16.msra.mxu0 %v1764_v61  ;;  %1672 = vmatprep.subr.bf16.mxu1 %v1778_v0 }
 0x145   :  { %1656 = vmatprep.subr.bf16.mxu0 %v1778_v0 }
 0x147   :  { %1673 = vmatpush3.bf16.msra.mxu1 %v1763_v1 }
 0x148   :  { %1657 = vmatpush3.bf16.msra.mxu0 %v1766_v63  ;;  %1674 = vmatprep.subr.bf16.mxu1 %v1778_v0  ;;  %v1770_v63 = vld [vmem:[%s2206_s2 + $0x80] sm:$0xff]  }
 0x149   :  { %1658 = vmatprep.subr.bf16.mxu0 %v1778_v0 }
 0x14b   :  { %1675 = vmatpush3.bf16.msra.mxu1 %v1765_v3 }
 0x14c   :  { %1659 = vmatpush3.bf16.msra.mxu0 %v1768_v2  ;;  %1676 = vmatprep.subr.bf16.mxu1 %v1778_v0 }
 0x14d   :  { %1684 = vmatprep.subr.bf16.mxu0 %v1778_v0 }
 0x14f   :  { %1677 = vmatpush3.bf16.msra.mxu1 %v1767_v5  ;;  %v1773_v5 = vld [vmem:[%s2206_s2 + $0x98] sm:$0xff]  }
 0x150   :  { %1678 = vmatprep.subr.bf16.mxu1 %v1778_v0 }
 0x153   :  { %1679 = vmatpush3.bf16.msra.mxu1 %v1769_v6  ;;  %v1774_v6 = vld [vmem:[%s2206_s2 + $0xa0] sm:$0xff]  }
 0x1d9   :  { %v415_v8 = vpop.f32.mrb[8].mxu1 }
 0x1da   :  { %v1566_v9 = vpop.f32.mrb[9].mxu1 }
 0x1db   :  { %v418_v10 = vpop.f32.mrb[10].mxu1  ;;  %v1776_v9 = vld [vmem:[%s2206_s2 + $0xb0] sm:$0xff]  }
 0x1dc   :  { %v1567_v11 = vpop.f32.mrb[11].mxu1 }
 0x1e1   :  { %v504_v12 = vpop.f32.mrb[4].mxu0 }
 0x1e2   :  { %v505_v13 = vadd.f32 %v504_v12, %v415_v8  ;;  %v1586_v14 = vpop.f32.mrb[5].mxu0  ;;  %v1775_v8 = vld [vmem:[%s2206_s2 + $0xa8] sm:$0xff]  }
 0x1e3   :  { %v507_v15 = vpop.f32.mrb[6].mxu0 }
 0x1e4   :  { %v508_v16 = vadd.f32 %v507_v15, %v418_v10  ;;  %v1587_v17 = vpop.f32.mrb[7].mxu0  ;;  %v1777_v10 = vld [vmem:[%s2206_s2 + $0xb8] sm:$0xff]  }
 0x1f1   :  { %v734_v18 = vpop.f32.mrb[8].mxu0 }
 0x1f2   :  { %v1618_v19 = vpop.f32.mrb[9].mxu0 }
 0x1f3   :  { %v737_v20 = vpop.f32.mrb[10].mxu0 }
 0x1f4   :  { %v1619_v21 = vpop.f32.mrb[11].mxu0 }
 0x1f9   :  { %v613_v25 = vpop.f32.mrb[12].mxu1 }
 0x1fa   :  { %v620_v26 = vadd.f32 %v613_v25, %v505_v13  ;;  %v1606_v28 = vpop.f32.mrb[13].mxu1 }
 0x1fb   :  { %v616_v29 = vpop.f32.mrb[14].mxu1 }
 0x1fc   :  { %v626_v30 = vadd.f32 %v2131_v23, %v620_v26  ;;  %v621_v32 = vadd.f32 %v616_v29, %v508_v16  ;;  %v1607_v33 = vpop.f32.mrb[15].mxu1 }
 0x1fe   :  { %v628_v34 = vmax.f32 %v626_v30, 0.0  ;;  %v627_v36 = vadd.f32 %v2131_v23, %v621_v32 }
 0x200   :  { %v634_v37 = vmul.f32 %v2137_v31, %v628_v34  ;;  %v629_v38 = vmax.f32 %v627_v36, 0.0 }
 0x201   :  { %v802_v39 = vpop.f32.mrb[12].mxu0 }
 0x202   :  { %v640_v53 = vadd.f32 %v2140_v35, %v634_v37  ;;  %v803_v40 = vadd.f32 %v802_v39, %v734_v18  ;;  %v1630_v41 = vpop.f32.mrb[13].mxu0  ;;  %v635_v42 = vmul.f32 %v2137_v31, %v629_v38 }
 0x203   :  { %v805_v43 = vpop.f32.mrb[14].mxu0 }
 0x204   :  { %642 = vst [vmem:[%s2208_s4] sm:$0xff] %v640_v53  ;;  %v641_v55 = vadd.f32 %v2140_v35, %v635_v42  ;;  %v806_v44 = vadd.f32 %v805_v43, %v737_v20  ;;  %v1631_v45 = vpop.f32.mrb[15].mxu0 }
 0x206   :  { %643 = vst [vmem:[%s2208_s4 + $0x8] sm:$0xff] %v641_v55 }
 0x209   :  { %v881_v46 = vpop.f32.mrb[16].mxu1 }
 0x20a   :  { %v888_v47 = vadd.f32 %v881_v46, %v803_v40  ;;  %v1642_v48 = vpop.f32.mrb[17].mxu1 }
 0x20b   :  { %v884_v49 = vpop.f32.mrb[18].mxu1 }
 0x20c   :  { %v890_v50 = vadd.f32 %v888_v47, %v1955_v58  ;;  %v889_v51 = vadd.f32 %v884_v49, %v806_v44  ;;  %v1643_v52 = vpop.f32.mrb[19].mxu1 }
 0x20e   :  { %v892_v54 = vmax.f32 %v890_v50, 0.0  ;;  %v891_v56 = vadd.f32 %v889_v51, %v1955_v58  ;;  %v1771_v58 = vld [vmem:[%s2206_s2 + $0x88] sm:$0xff]  }
 0x210   :  { %v894_v57 = vmul.f32 %v892_v54, %v1961_v4  ;;  %v893_v59 = vmax.f32 %v891_v56, 0.0 }
 0x212   :  { %v896_v60 = vadd.f32 %v894_v57, %v1964_v7  ;;  %v895_v61 = vmul.f32 %v893_v59, %v1961_v4 }
 0x214   :  { %898 = vst [vmem:[#allocation3 + $0x1] sm:$0xff] %v896_v60  ;;  %v897_v62 = vadd.f32 %v895_v61, %v1964_v7  ;;  %v1772_v7 = vld [vmem:[%s2206_s2 + $0x90] sm:$0xff]  }
 0x216   :  { %899 = vst [vmem:[#allocation3 + $0x9] sm:$0xff] %v897_v62  ;;  %v921_v1 = vpack.c.bf16 %v897_v62, %v896_v60 }
 0x218   :  { %1661 = vmatmul.mubr.bf16.vlgmr.msra.gmra.mrb[16].mxu0 %v921_v1 }
 0x219   :  { %1685 = vmatpush3.bf16.msra.mxu0 %v1770_v63  ;;  %1700 = vmatprep.mubr.msk.bf16.mxu0 %vm1779_vm1, %v1778_v0 }
 0x21a   :  { %1686 = vmatprep.subr.bf16.mxu0 %v1778_v0 }
 0x21b   :  { %v900_v4 = vld [vmem:[#allocation3] sm:$0xff] }
 0x21d   :  { %v901_v2 = vld [vmem:[#allocation3 + $0x8] sm:$0xff]  ;;  %1687 = vmatpush3.bf16.msra.mxu0 %v1771_v58 }
 0x21e   :  { %v902_v3 = vpack.c.bf16 %v901_v2, %v900_v4  ;;  %1688 = vmatprep.subr.bf16.mxu0 %v1778_v0  ;;  %v1116_v11 = vld [vmem:[#allocation3 + $0x2] sm:$0xff]  ;;  %v1117_v12 = vld [vmem:[#allocation3 + $0xa] sm:$0xff] }
 0x21f   :  { %v1118_v13 = vpack.c.bf16 %v1117_v12, %v1116_v11 }
 0x220   :  { %1681 = vmatmul.mubr.bf16.vlgmr.msra.gmra.mrb[20].mxu1 %v902_v3 }
 0x221   :  { %1689 = vmatpush3.bf16.msra.mxu0 %v1772_v7 }
 0x222   :  { %1690 = vmatprep.subr.bf16.mxu0 %v1778_v0 }
 0x225   :  { %1691 = vmatpush3.bf16.msra.mxu0 %v1773_v5 }
 0x226   :  { %1692 = vmatprep.subr.bf16.mxu0 %v1778_v0 }
 0x229   :  { %1693 = vmatpush3.bf16.msra.mxu0 %v1774_v6 }
 0x22a   :  { %1694 = vmatprep.subr.bf16.mxu0 %v1778_v0 }
 0x22d   :  { %1695 = vmatpush3.bf16.msra.mxu0 %v1775_v8 }
 0x22e   :  { %1696 = vmatprep.subr.bf16.mxu0 %v1778_v0 }
 0x231   :  { %1697 = vmatpush3.bf16.msra.mxu0 %v1776_v9 }
 0x232   :  { %1698 = vmatprep.subr.bf16.mxu0 %v1778_v0 }
 0x235   :  { %1699 = vmatpush3.bf16.msra.mxu0 %v1777_v10 }
 0x238   :  { %1701 = vmatmul.mubr.bf16.vlgmr.msra.gmra.mrb[20].mxu0 %v1118_v13 }
 0x2eb   :  { %v1020_v14 = vpop.f32.mrb[16].mxu0 }
 0x2ec   :  { %v1662_v15 = vpop.f32.mrb[17].mxu0 }
 0x2ed   :  { %v1023_v16 = vpop.f32.mrb[18].mxu0 }
 0x2ee   :  { %v1663_v17 = vpop.f32.mrb[19].mxu0 }
 0x2f3   :  { %v1109_v18 = vpop.f32.mrb[20].mxu1 }
 0x2f4   :  { %v1110_v19 = vadd.f32 %v1109_v18, %v1020_v14  ;;  %v1682_v20 = vpop.f32.mrb[21].mxu1 }
 0x2f5   :  { %v1112_v21 = vpop.f32.mrb[22].mxu1 }
 0x2f6   :  { %v1113_v22 = vadd.f32 %v1112_v21, %v1023_v16  ;;  %v1683_v24 = vpop.f32.mrb[23].mxu1 }
 0x30b   :  { %v1217_v25 = vpop.f32.mrb[20].mxu0 }
 0x30c   :  { %v1224_v26 = vadd.f32 %v1217_v25, %v1110_v19  ;;  %v1702_v27 = vpop.f32.mrb[21].mxu0 }
 0x30d   :  { %v1220_v28 = vpop.f32.mrb[22].mxu0 }
 0x30e   :  { %v1226_v0 = vadd.f32 %v1224_v26, %v2131_v23  ;;  %v1225_v29 = vadd.f32 %v1220_v28, %v1113_v22  ;;  %v1703_v30 = vpop.f32.mrb[23].mxu0 }
 0x310   :  { %v1228_v32 = vmax.f32 %v1226_v0, 0.0  ;;  %v1227_v33 = vadd.f32 %v1225_v29, %v2131_v23 }
 0x312   :  { %v1230_v34 = vmul.f32 %v1228_v32, %v2137_v31  ;;  %v1229_v36 = vmax.f32 %v1227_v33, 0.0 }
 0x314   :  { %v1232_v37 = vadd.f32 %v1230_v34, %v2140_v35  ;;  %v1231_v38 = vmul.f32 %v1229_v36, %v2137_v31 }
 0x316   :  { %1417 = vst [vmem:[%s2208_s4 + $0x10] sm:$0xff] %v1232_v37  ;;  %v1233_v39 = vadd.f32 %v1231_v38, %v2140_v35 }
 0x318   :  { %1418 = vst [vmem:[%s2208_s4 + $0x18] sm:$0xff] %v1233_v39 }

</bundles_post_ra>
